<compile_context>
chip_gen: v7x
topology: tpu7x:2x2x1
jax: 0.10.0
libtpu: 0.0.40
codegen_flags: <defaults>
</compile_context>

<pallas_src>
import jax
import jax.numpy as jnp
from jax.experimental import pallas as pl
from jax.experimental.pallas import tpu as pltpu

NUM_CLASSES = 4
ROI = (8, 16, 16)          # scaled-down analogue of (24, 128, 128)
EMBED_DIM = 32

# TODO(synk): the autoencoder passed to AnatomicalConstraint_loss is external and
# unspecified; compute_embeddings is synthesized here as one-hot -> linear -> tanh.


def _largest_divisor_tile(total, step, cap):
    """Largest multiple-of-`step` divisor of `total` that is <= cap (else full extent)."""
    cands = [t for t in range(step, min(cap, total) + 1, step) if total % t == 0]
    return max(cands) if cands else total


# --------------------------------------------------------------------------- #
# Kernel 1: channel argmax on raw logits (softmax-invariant), lane-dense tiles #
# --------------------------------------------------------------------------- #
def _argmax_kernel(x_ref, out_ref):
    # x_ref: [1, C, ROWS, 128] raw logits; out_ref: [1, ROWS, 128] int8 labels
    x = x_ref[0]                                    # [C, ROWS, 128]
    best = x[0]
    idx = jnp.zeros(best.shape, jnp.int32)
    for c in range(1, x.shape[0]):                  # static unroll, C is tiny
        cur = x[c]
        better = cur > best                         # strict > keeps first index on ties
        idx = jnp.where(better, c, idx)
        best = jnp.where(better, cur, best)
    out_ref[0] = idx.astype(jnp.int8)               # labels fit in 2 bits


def argmax_labels(net_output):
    """argmax over the channel dim (softmax dropped: argmax is invariant)."""
    B, C, D, H, W = net_output.shape
    S = D * H * W
    assert S % 128 == 0, "D*H*W must be a multiple of 128 for the lane-dense layout"
    rows = S // 128
    # ~0.5 MiB/channel per tile max; 4 MiB double-buffered input — fine on all gens.
    tile_rows = _largest_divisor_tile(rows, step=8, cap=1024)
    x = net_output.reshape(B, C, rows, 128)
    out = pl.pallas_call(
        _argmax_kernel,
        out_shape=jax.ShapeDtypeStruct((B, rows, 128), jnp.int8),
        grid=(B, rows // tile_rows),
        in_specs=[pl.BlockSpec((1, C, tile_rows, 128), lambda b, r: (b, 0, r, 0))],
        out_specs=pl.BlockSpec((1, tile_rows, 128), lambda b, r: (b, r, 0)),
        compiler_params=pltpu.CompilerParams(
            dimension_semantics=("parallel", "parallel"),
            vmem_limit_bytes=32 * 1024 * 1024),
    )(x)
    return out.reshape(B, D, H, W)


# --------------------------------------------------------------------------- #
# Kernel 2: one-hot @ native-layout bf16 encoder stream (split S-reduction)    #
# --------------------------------------------------------------------------- #
def _embed_partial_kernel(lbl_ref, w_ref, out_ref):
    # lbl_ref: [2B, TILE_S] int8 labels (pred rows 0..B-1, tgt rows B..2B-1)
    # w_ref:   [C, TILE_S, E] bf16 encoder weight tile (native layout, no repack)
    # out_ref: [1, 2B, E] f32 pre-tanh partial sum, resident across the k axis
    @pl.when(pl.program_id(1) == 0)
    def _():
        out_ref[...] = jnp.zeros_like(out_ref)

    lbl = lbl_ref[...].astype(jnp.int32)            # cheap upcast; HBM traffic stays i8
    acc = jnp.zeros((lbl.shape[0], out_ref.shape[-1]), jnp.float32)
    for c in range(NUM_CLASSES):                    # per-class dots: no [2B, C*TILE_S]
        onehot_c = (lbl == c).astype(jnp.bfloat16)  # exact 0/1 -> lossless bf16
        acc = acc + jnp.dot(onehot_c, w_ref[c], preferred_element_type=jnp.float32)
    out_ref[0] += acc


def embed_partial_sums(lbl, w_bf16, *, tile_s_cap=8192):
    """Stream w over an S-reduction grid; return per-split pre-activation sums."""
    two_b, S = lbl.shape
    C, Sw, E = w_bf16.shape
    assert Sw == S and S % 128 == 0
    # tile_s ~8192 amortizes the ~0.35us/step pipeline overhead while keeping the
    # double-buffered w tile at 2*C*tile_s*E*2 B = 4 MiB — safe even on v7x (64 MiB VMEM).
    tile_s = _largest_divisor_tile(S, step=128, cap=tile_s_cap)
    num_k = S // tile_s
    # v7x megacore: split the reduction across the two TensorCores.  Each split owns
    # its own resident [2B, E] output block (zeroed at k==0), so no shared-acc race;
    # on 1-TC chips the splits simply run back-to-back.
    num_splits = 2 if (num_k % 2 == 0 and num_k >= 2) else 1
    steps = num_k // num_splits

    partials = pl.pallas_call(
        _embed_partial_kernel,
        out_shape=jax.ShapeDtypeStruct((num_splits, two_b, E), jnp.float32),
        grid=(num_splits, steps),
        in_specs=[
            pl.BlockSpec((two_b, tile_s), lambda s, k: (0, s * steps + k)),
            pl.BlockSpec((C, tile_s, E), lambda s, k: (0, s * steps + k, 0)),
        ],
        out_specs=pl.BlockSpec((1, two_b, E), lambda s, k: (s, 0, 0)),
        compiler_params=pltpu.CompilerParams(
            dimension_semantics=("parallel", "arbitrary"),
            vmem_limit_bytes=32 * 1024 * 1024),
    )(lbl, w_bf16)
    return partials


def embed_mse(pred_labels, tgt_labels, w_bf16, bias, *, tile_s_cap=8192):
    B = pred_labels.shape[0]
    # Lane-dense label pack: pred rows stacked over tgt rows -> [2B, S] int8.
    lbl = jnp.concatenate(
        [pred_labels.reshape(B, -1), tgt_labels.reshape(B, -1)], axis=0
    ).astype(jnp.int8)
    partials = embed_partial_sums(lbl, w_bf16, tile_s_cap=tile_s_cap)
    pre = partials.sum(axis=0)                      # [2B, E] pre-tanh sums
    emb = jnp.tanh(pre + bias)                      # tiny epilogue: plain JAX
    d = emb[:B] - emb[B:]                           # pred - tgt
    return jnp.mean(d * d)                          # F.mse_loss 'mean'


# --------------------------------------------------------------------------- #
# JAX glue: CropForeground bbox + SpatialCrop + CenterSpatialCrop + SpatialPad #
# (data-dependent indexing, expressed as a fixed-shape masked gather)          #
# --------------------------------------------------------------------------- #
def _compute_bbox_hw(tgt_vol):
    # tgt_vol: [D, H, W]; MONAI-style bbox (inclusive start, exclusive end) over H, W
    fg = tgt_vol > 0

    def minmax(mask):
        n = mask.shape[0]
        idx = jnp.arange(n)
        has = jnp.any(mask)
        start = jnp.where(has, jnp.min(jnp.where(mask, idx, n)), 0)
        end = jnp.where(has, jnp.max(jnp.where(mask, idx, -1)) + 1, 0)
        return start, end

    hs, he = minmax(jnp.any(fg, axis=(0, 2)))
    ws, we = minmax(jnp.any(fg, axis=(0, 1)))
    return hs, he, ws, we


def _dim_map(n, r, bstart, dim_size):
    # crop to [bstart, bstart+n), center-crop to min(r, n), pad symmetrically to r
    cstart = jnp.maximum(n // 2 - r // 2, 0)        # CenterSpatialCrop start
    m = jnp.minimum(r, n)                           # effective size after center crop
    left = (r - m) // 2                             # SpatialPad (symmetric) left pad
    o = jnp.arange(r)
    src = o - left + cstart + bstart
    valid = (o >= left) & (o < left + m)
    return jnp.clip(src, 0, dim_size - 1), valid


def _crop_center_pad(vol, hs, he, ws, we, roi):
    # vol: [D, H, W] int8 label volume; depth uses the full range (box 0..D)
    D, H, W = vol.shape
    rd, rh, rw = roi
    s0, v0 = _dim_map(jnp.int32(D), rd, jnp.int32(0), D)
    s1, v1 = _dim_map(he - hs, rh, hs, H)
    s2, v2 = _dim_map(we - ws, rw, ws, W)
    out = vol[s0[:, None, None], s1[None, :, None], s2[None, None, :]]
    mask = v0[:, None, None] & v1[None, :, None] & v2[None, None, :]
    return jnp.where(mask, out, 0)                  # pad value 0 == background class


# --------------------------------------------------------------------------- #
# Full forward pass                                                            #
# --------------------------------------------------------------------------- #
def anatomical_constraint_loss(net_output, target, w_bf16, bias, *, tile_s_cap=8192):
    # NOTE: cast the encoder weight to bf16 ONCE outside the training step and
    # pass it here (w_bf16); the cast must not be re-run every step.
    pred_labels = argmax_labels(net_output)         # [B, D, H, W] int8   (Pallas)
    tgt_vol = target[:, 0].astype(jnp.int8)         # [B, D, H, W]

    def per_sample(pred_i, tgt_i):
        hs, he, ws, we = _compute_bbox_hw(tgt_i)    # bbox from the target only
        t_roi = _crop_center_pad(tgt_i, hs, he, ws, we, ROI)
        p_roi = _crop_center_pad(pred_i, hs, he, ws, we, ROI)
        return p_roi, t_roi

    pred_roi, tgt_roi = jax.vmap(per_sample)(pred_labels, tgt_vol)
    return embed_mse(pred_roi, tgt_roi, w_bf16, bias, tile_s_cap=tile_s_cap)


# --------------------------------------------------------------------------- #
# Pure-JAX reference (for sanity check of the Pallas kernels)                  #
# --------------------------------------------------------------------------- #
def reference_loss(net_output, target, w, bias):
    p = jax.nn.softmax(net_output, axis=1)
    pred_labels = jnp.argmax(p, axis=1).astype(jnp.int8)
    tgt_vol = target[:, 0].astype(jnp.int8)

    def per_sample(pred_i, tgt_i):
        hs, he, ws, we = _compute_bbox_hw(tgt_i)
        return (_crop_center_pad(pred_i, hs, he, ws, we, ROI),
                _crop_center_pad(tgt_i, hs, he, ws, we, ROI))

    pred_roi, tgt_roi = jax.vmap(per_sample)(pred_labels, tgt_vol)

    def embed(lbl):
        oh = jax.nn.one_hot(lbl.reshape(lbl.shape[0], -1), NUM_CLASSES, axis=1)  # [B,C,S]
        return jnp.tanh(jnp.einsum('bcs,cse->be', oh, w) + bias)

    d = embed(pred_roi) - embed(tgt_roi)
    return jnp.mean(d * d)


if __name__ == "__main__":
    key = jax.random.PRNGKey(0)
    k1, k2, k3, k4 = jax.random.split(key, 4)

    B, C, D, H, W = 2, NUM_CLASSES, 8, 32, 32
    net_output = jax.random.normal(k1, (B, C, D, H, W), jnp.float32)

    # ground-truth labels with a non-trivial foreground bbox
    labels = jax.random.randint(k2, (B, 1, D, H, W), 0, NUM_CLASSES)
    fg_region = jnp.zeros((D, H, W), bool).at[:, 5:27, 4:28].set(True)
    target = jnp.where(fg_region[None, None], labels, 0).astype(jnp.int32)

    # deterministic synthetic autoencoder encoder params
    S_roi = ROI[0] * ROI[1] * ROI[2]
    w = jax.random.normal(k3, (NUM_CLASSES, S_roi, EMBED_DIM), jnp.float32) * 0.02
    bias = jax.random.normal(k4, (1, EMBED_DIM), jnp.float32) * 0.01
    w_bf16 = w.astype(jnp.bfloat16)   # bf16 cast hoisted (cache across steps)

    # Small tile_s_cap here so the toy shape exercises the multi-step reduction
    # and the two-way core split; production default is tile_s_cap=8192.
    loss = anatomical_constraint_loss(net_output, target, w_bf16, bias, tile_s_cap=512)
    loss = jax.block_until_ready(loss)

    ref = reference_loss(net_output, target, w, bias)
    # Kernel uses bf16 weights on the MXU path; reference is full f32.
    assert jnp.allclose(loss, ref, rtol=2e-2, atol=1e-3), (float(loss), float(ref))

    print("KERNEL_OK")
</pallas_src>

<mosaic_0001>
module attributes {stable_mosaic.version = 11 : i64} {
  func.func @_argmax_kernel(%arg0: i32, %arg1: i32, %arg2: memref<1x4x64x128xf32, #tpu.memory_space<vmem>>, %arg3: memref<1x64x128xi8, #tpu.memory_space<vmem>>) attributes {dimension_semantics = [#tpu.dimension_semantics<parallel>, #tpu.dimension_semantics<parallel>], iteration_bounds = array<i64: 2, 1>, scalar_prefetch = 0 : i64, scratch_operands = 0 : i64, tpu.core_type = #tpu.core_type<tc>, window_params = [{transform_indices = @transform_0, window_bounds = array<i64: 1, 4, 64, 128>}, {transform_indices = @transform_1, window_bounds = array<i64: 1, 64, 128>}]} {
    %c0 = arith.constant 0 : index
    %c0_0 = arith.constant 0 : index
    %c0_1 = arith.constant 0 : index
    %c0_2 = arith.constant 0 : index
    %0 = vector.load %arg2[%c0, %c0_0, %c0_1, %c0_2] : memref<1x4x64x128xf32, #tpu.memory_space<vmem>>, vector<1x4x64x128xf32>
    %1 = vector.shape_cast %0 : vector<1x4x64x128xf32> to vector<4x64x128xf32>
    %2 = vector.extract_strided_slice %1 {offsets = [0, 0, 0], sizes = [1, 64, 128], strides = [1, 1, 1]} : vector<4x64x128xf32> to vector<1x64x128xf32>
    %3 = vector.shape_cast %2 : vector<1x64x128xf32> to vector<64x128xf32>
    %c0_i32 = arith.constant 0 : i32
    %4 = vector.broadcast %c0_i32 : i32 to vector<64x128xi32>
    %5 = vector.extract_strided_slice %1 {offsets = [1, 0, 0], sizes = [1, 64, 128], strides = [1, 1, 1]} : vector<4x64x128xf32> to vector<1x64x128xf32>
    %6 = vector.shape_cast %5 : vector<1x64x128xf32> to vector<64x128xf32>
    %7 = arith.cmpf ogt, %6, %3 : vector<64x128xf32>
    %c1_i32 = arith.constant 1 : i32
    %8 = vector.broadcast %c1_i32 : i32 to vector<64x128xi32>
    %9 = arith.select %7, %8, %4 : vector<64x128xi1>, vector<64x128xi32>
    %10 = arith.select %7, %6, %3 : vector<64x128xi1>, vector<64x128xf32>
    %11 = vector.extract_strided_slice %1 {offsets = [2, 0, 0], sizes = [1, 64, 128], strides = [1, 1, 1]} : vector<4x64x128xf32> to vector<1x64x128xf32>
    %12 = vector.shape_cast %11 : vector<1x64x128xf32> to vector<64x128xf32>
    %13 = arith.cmpf ogt, %12, %10 : vector<64x128xf32>
    %c2_i32 = arith.constant 2 : i32
    %14 = vector.broadcast %c2_i32 : i32 to vector<64x128xi32>
    %15 = arith.select %13, %14, %9 : vector<64x128xi1>, vector<64x128xi32>
    %16 = arith.select %13, %12, %10 : vector<64x128xi1>, vector<64x128xf32>
    %17 = vector.extract_strided_slice %1 {offsets = [3, 0, 0], sizes = [1, 64, 128], strides = [1, 1, 1]} : vector<4x64x128xf32> to vector<1x64x128xf32>
    %18 = vector.shape_cast %17 : vector<1x64x128xf32> to vector<64x128xf32>
    %19 = arith.cmpf ogt, %18, %16 : vector<64x128xf32>
    %c3_i32 = arith.constant 3 : i32
    %20 = vector.broadcast %c3_i32 : i32 to vector<64x128xi32>
    %21 = arith.select %19, %20, %15 : vector<64x128xi1>, vector<64x128xi32>
    %22 = arith.trunci %21 : vector<64x128xi32> to vector<64x128xi8>
    %c0_3 = arith.constant 0 : index
    %c0_4 = arith.constant 0 : index
    %c0_5 = arith.constant 0 : index
    %23 = vector.load %arg3[%c0_3, %c0_4, %c0_5] : memref<1x64x128xi8, #tpu.memory_space<vmem>>, vector<1x64x128xi8>
    %24 = vector.shape_cast %23 : vector<1x64x128xi8> to vector<64x128xi8>
    %25 = vector.shape_cast %22 : vector<64x128xi8> to vector<1x64x128xi8>
    tpu.vector_store %arg3[%c0_3, %c0_4, %c0_5], %25 {strides = array<i32>} : memref<1x64x128xi8, #tpu.memory_space<vmem>>, vector<1x64x128xi8>,
    return
  }
  func.func @transform_0(%arg0: i32, %arg1: i32) -> (i32, i32, i32, i32) {
    %c0_i32 = arith.constant 0 : i32
    %c0_i32_0 = arith.constant 0 : i32
    %c0_i32_1 = arith.constant 0 : i32
    return %arg0, %c0_i32, %arg1, %c0_i32_0 : i32, i32, i32, i32
  }
  func.func @transform_1(%arg0: i32, %arg1: i32) -> (i32, i32, i32) {
    %c0_i32 = arith.constant 0 : i32
    %c0_i32_0 = arith.constant 0 : i32
    return %arg0, %arg1, %c0_i32 : i32, i32, i32
  }
}

</mosaic_0001>

<bundles_post_ra>
// kernel: tpu_custom_call.1
= control target key start
LH: loop header
LB: loop body
LE: loop exit
PB: predicated region body
PF: predicated region fallthrough
CT: control target
= control target key end

     0   :  { %6 = vsyncpa [#allocation3], 0  ;;  %s789_s0 = inlined_call_operand.hbm [shape: f32[2,4,64,128], index: 0, kind: input, shape index: {}]   ;;  %s790_s1 = inlined_call_operand.hbm [shape: s8[2,64,128], index: 1, kind: output, shape index: {}]  }
   0x1   :  { %8 = vsyncpa [#allocation3 + $0x1], 0 }
   0x2   :  { %9 = vsyncpa [#allocation4], 0 }
   0x3   :  { %11 = vsyncpa [#allocation4 + $0x1], 0  ;;  %s577_s6 = smov 0   ;;  %s579_s7 = smov 0  }
   0x4   :  { %s581_s8 = smov 0   ;;  %s583_s9 = smov 0  }
   0x5   :  { %s585_s10 = smov 0   ;;  %s587_s11 = smov 0  }
   0x6 LB: > { %s362_s12 = sadd.s32 4294967295, %s558_s11   ;;  %s363_s13 = sadd.s32 4294967294, %s558_s11   ;;  %s558_s11 = sphi %s587_s11, %s17_s11   ;;  %s554_s10 = sphi %s585_s10, %s805_s10   ;;  %s550_s9 = sphi %s583_s9, %s804_s9   ;;  %s546_s8 = sphi %s581_s8, %s803_s8   ;;  %s542_s7 = sphi %s579_s7, %s802_s7   ;;  %s538_s6 = sphi %s577_s6, %s801_s6  }
   0x7   : > { %s29_s14 = sadd.s32 1, %s554_s10  ;;  %s38_s15 = sadd.s32 1, %s546_s8 }
   0x8   : > { %p31_p0 = scmp.ge.s32.totalorder %s29_s14, 2  ;;  %p45_p1 = scmp.ne.s32.totalorder %s546_s8, %s542_s7 }
   0x9   : > { %p46_p2 = scmp.eq.s32.totalorder %s558_s11, 0  ;;  %p51_p3 = scmp.ne.s32.totalorder %s542_s7, %s538_s6 }
   0xa   : > { %s807_s14 = smov (%p31_p0, %s29_s14), 0  ;;  %p52_p5 = scmp.eq.s32.totalorder %s362_s12, 0 }
   0xb   : > { %p618_p4 = por %p46_p2, %p45_p1  ;;  %s33_s17 = ssub.s32 %s554_s10, %s807_s14 }
   0xc   : > { %p77_p6 = scmp.eq.s32.totalorder %s362_s12, 1  ;;  %p36_p7 = scmp.eq.s32.totalorder %s33_s17, 0 }
   0xd   : > { %p624_p8 = por %p52_p5, %p51_p3  ;;  %p83_p10 = scmp.eq.s32.totalorder %s363_s13, 1 }
   0xe   : > { %p628_p9 = por %p77_p6, %p45_p1  ;;  %p391_p13 = scmp.lt.s32.totalorder %s558_s11, 2 }
   0xf   : > { %s633_s20 = scalar_select %p36_p7, %s546_s8, %s38_s15  }
  0x10   : > { %s794_s19 = scalar_select %p628_p9, 1, 0 }
  0x11   : > { %p635_p11 = por %p83_p10, %p51_p3  ;;  %s103_s22 = sand.u32 1, %s546_s8  }
  0x12   : > { %s366_s23 = sshll.u32 %s103_s22, 8  ;;  %s377_s24 = sshll.u32 %s554_s10, 12 }
  0x13   : > { %s795_s21 = scalar_select %p635_p11, 1, 0 }
  0x14   : > { %s646_s27 = scalar_lea.hbm %s789_s0, %s377_s24  ;;  %s107_s28 = scalar_lea.vmem [#allocation2], %s366_s23 }
  0x15   : > { %s116_s29 = sshll.u32 %s107_s28, 4  ;;  %p652_p0 = pnand %p391_p13, %p618_p4  ;;  %s648_s29 = int_to_ptr.vmem [resolvable:$true] %s116_s29 }
  0x16   : > { %s657_s2 = scalar_lea.sflag [#allocation3], %s103_s22  ;;  %s446_s3 = scalar_lea.hbm %s646_s27, 4096 }
  0x17   : > { %p447_p2 = scmp.ne.s32.totalorder %s646_s27, %s446_s3  ;;  %p448_p3 = pneg %p652_p0 }
  0x18   : > { %s451_s12 = scalar_lea.hbm %s789_s0, 8192  ;;  %p452_p4 = scmp.lt.u32.totalorder %s646_s27, %s789_s0 }
  0x19   : > { %p449_p5 = pnand %p448_p3, %p447_p2  ;;  %p453_p7 = scmp.lt.u32.totalorder %s451_s12, %s446_s3 }
  0x1a   : > { %p455_p13 = scmp.lt.u32.totalorder %s446_s3, %s646_s27 }
  0x1b   : > { %p450_p6 = pneg %p449_p5  ;;  %p454_p10 = por %p453_p7, %p452_p4 }
  0x1d   : > { %p456_p12 = por %p455_p13, %p454_p10 }
  0x1f   : > { %p457_p1 = pnand %p456_p12, %p450_p6 }
  0x21   : > { %460 = shalt.err (!%p457_p1)
}
  0x22   : > { %s461_s16 = scalar_lea.vmem %s648_s29, 4096  ;;  %s560_s17 = smov [#allocation2]  }
  0x23   : > { %p462_p2 = scmp.ne.s32.totalorder %s648_s29, %s461_s16  ;;  %s466_s22 = sshll.u32 %s560_s17, 4  ;;  %s467_s22 = int_to_ptr.vmem [resolvable:$false] %s466_s22 }
  0x24   : > { %s468_s23 = scalar_lea.vmem %s467_s22, 8192  ;;  %p469_p9 = scmp.lt.s32.totalorder %s648_s29, %s467_s22 }
  0x25   : > { %p464_p5 = pnand %p462_p2, %p448_p3  ;;  %p470_p4 = scmp.lt.s32.totalorder %s468_s23, %s461_s16 }
  0x27   : > { %p465_p11 = pneg %p464_p5  ;;  %p471_p7 = por %p470_p4, %p469_p9 }
  0x29   : > { %p472_p10 = pnand %p471_p7, %p465_p11 }
  0x2b   : > { %475 = shalt.err (!%p472_p10)
}
  0x2c   : > { %s561_s24 = smov 128   ;;  %s562_s25 = smov 8  }
  0x2d   : > { %386 = dma.hbm_to_vmem [thread:$0]  (!%p652_p0), %s646_s27, 4096, %s648_s29, %s657_s2, %s561_s24, %s561_s24, %s562_s25  }
  0x2e   : > { %p124_p12 = scmp.lt.s32.totalorder %s558_s11, 3  ;;  %p797_p1 = scmp.ge.s32.totalorder %s558_s11, 1 }
  0x30   : > { %p125_p3 = pnand %p797_p1, %p124_p12 }
  0x31   : > { %s689_s26 = sand.u32 (!%p125_p3), 1, %s542_s7  }
  0x32   : > { %128 = sbr.rel (%p125_p3) target bundleno = 97 (0x61), region = 24  ;;  %s370_s28 = sshll.u32 (!%p125_p3), %s689_s26, 8 }
  0x33   : > { %s131_s3 = scalar_lea.sflag (!%p125_p3), [#allocation3], %s689_s26  ;;  %s693_s4 = scalar_lea.vmem (!%p125_p3), [#allocation2], %s370_s28 }
  0x39   : > { %529 = dma.done.wait (%p624_p8), %s131_s3, 4096  }
  0x3a   : > { %531 = vsyncadd (%p624_p8), %s131_s3, 4294963200  ;;  %v155_v0 = vld [vmem:[%s693_s4] sm:$0xff]  ;;  %v156_v1 = vld [vmem:[%s693_s4 + $0x8] sm:$0xff]  ;;  %v563_v12 = vmov 0   ;;  %s371_s18 = sshll.u32 %s689_s26, 4  ;;  %s378_s30 = sshll.u32 %s550_s9, 8 }
  0x3b   : > { %v157_v2 = vld [vmem:[%s693_s4 + $0x10] sm:$0xff]  ;;  %v158_v3 = vld [vmem:[%s693_s4 + $0x18] sm:$0xff]  ;;  %v163_v4 = vld [vmem:[%s693_s4 + $0x40] sm:$0xff]  ;;  %s152_s27 = scalar_lea.vmem [#allocation5], %s371_s18  ;;  %s740_s12 = scalar_lea.hbm %s790_s1, %s378_s30 }
  0x3c   : > { %v164_v5 = vld [vmem:[%s693_s4 + $0x48] sm:$0xff]  ;;  %v165_v6 = vld [vmem:[%s693_s4 + $0x50] sm:$0xff]  ;;  %v166_v7 = vld [vmem:[%s693_s4 + $0x58] sm:$0xff]  ;;  %vm187_vm0 = vcmp.gt.f32.partialorder %v163_v4, %v155_v0  ;;  %s275_s29 = sshll.u32 %s152_s27, 4  ;;  %s260_s13 = scalar_lea.sflag [#allocation4], %s689_s26  ;;  %s735_s29 = int_to_ptr.vmem [resolvable:$true] %s275_s29 }
  0x3d   : > { %v171_v8 = vld [vmem:[%s693_s4 + $0x80] sm:$0xff]  ;;  %vm188_vm1 = vcmp.gt.f32.partialorder %v164_v5, %v156_v1  ;;  %v172_v9 = vld [vmem:[%s693_s4 + $0x88] sm:$0xff]  ;;  %v173_v10 = vld [vmem:[%s693_s4 + $0x90] sm:$0xff]  ;;  %vm189_vm2 = vcmp.gt.f32.partialorder %v165_v6, %v157_v2  ;;  %vm190_vm3 = vcmp.gt.f32.partialorder %v166_v7, %v158_v3  ;;  %v195_v13 = vsel %vm187_vm0, 1, %v563_v12  ;;  %s476_s15 = scalar_lea.vmem %s735_s29, 256  ;;  %p798_p9 = scmp.ne.s32.totalorder %s794_s19, 0 }
  0x3e   : > { %v174_v11 = vld [vmem:[%s693_s4 + $0x98] sm:$0xff]  ;;  %v196_v14 = vsel %vm188_vm1, 1, %v563_v12  ;;  %v197_v15 = vsel %vm189_vm2, 1, %v563_v12  ;;  %v198_v16 = vsel %vm190_vm3, 1, %v563_v12  ;;  %v203_v17 = vsel %vm187_vm0, %v163_v4, %v155_v0  ;;  %v179_v19 = vld [vmem:[%s693_s4 + $0xc0] sm:$0xff]  ;;  %v180_v20 = vld [vmem:[%s693_s4 + $0xc8] sm:$0xff]  ;;  %p477_p8 = scmp.ne.s32.totalorder %s735_s29, %s476_s15 }
  0x3f   : > { %v204_v18 = vsel %vm188_vm1, %v164_v5, %v156_v1  ;;  %v181_v21 = vld [vmem:[%s693_s4 + $0xd0] sm:$0xff]  ;;  %v205_v22 = vsel %vm189_vm2, %v165_v6, %v157_v2  ;;  %v206_v23 = vsel %vm190_vm3, %v166_v7, %v158_v3  ;;  %vm211_vm4 = vcmp.gt.f32.partialorder %v171_v8, %v203_v17  ;;  %v182_v24 = vld [vmem:[%s693_s4 + $0xd8] sm:$0xff]  ;;  %v159_v27 = vld [vmem:[%s693_s4 + $0x20] sm:$0xff]  ;;  %s564_s9 = smov [#allocation5]  }
  0x40   : > { %vm212_vm5 = vcmp.gt.f32.partialorder %v172_v9, %v204_v18  ;;  %vm213_vm6 = vcmp.gt.f32.partialorder %v173_v10, %v205_v22  ;;  %vm214_vm7 = vcmp.gt.f32.partialorder %v174_v11, %v206_v23  ;;  %v219_v25 = vsel %vm211_vm4, 2, %v195_v13  ;;  %v160_v28 = vld [vmem:[%s693_s4 + $0x28] sm:$0xff]  ;;  %v161_v33 = vld [vmem:[%s693_s4 + $0x30] sm:$0xff]  ;;  %v162_v34 = vld [vmem:[%s693_s4 + $0x38] sm:$0xff]  ;;  %p478_p11 = pnand %p477_p8, %p798_p9  ;;  %s480_s16 = sshll.u32 %s564_s9, 4  ;;  %s481_s16 = int_to_ptr.vmem [resolvable:$false] %s480_s16 }
  0x41   : > { %v220_v26 = vsel %vm212_vm5, 2, %v196_v14  ;;  %v221_v29 = vsel %vm213_vm6, 2, %v197_v15  ;;  %v222_v30 = vsel %vm214_vm7, 2, %v198_v16  ;;  %v227_v31 = vsel %vm211_vm4, %v171_v8, %v203_v17  ;;  %v167_v35 = vld [vmem:[%s693_s4 + $0x60] sm:$0xff]  ;;  %v168_v38 = vld [vmem:[%s693_s4 + $0x68] sm:$0xff]  ;;  %v169_v39 = vld [vmem:[%s693_s4 + $0x70] sm:$0xff]  ;;  %p483_p6 = scmp.lt.s32.totalorder %s735_s29, %s481_s16 }
  0x42   : > { %v228_v32 = vsel %vm212_vm5, %v172_v9, %v204_v18  ;;  %v229_v36 = vsel %vm213_vm6, %v173_v10, %v205_v22  ;;  %v230_v37 = vsel %vm214_vm7, %v174_v11, %v206_v23  ;;  %vm235_vm8 = vcmp.gt.f32.partialorder %v179_v19, %v227_v31  ;;  %v170_v40 = vld [vmem:[%s693_s4 + $0x78] sm:$0xff]  ;;  %v175_v47 = vld [vmem:[%s693_s4 + $0xa0] sm:$0xff]  ;;  %v176_v48 = vld [vmem:[%s693_s4 + $0xa8] sm:$0xff]  ;;  %p479_p0 = pneg %p478_p11  ;;  %s482_s17 = scalar_lea.vmem %s481_s16, 512 }
  0x43   : > { %vm236_vm9 = vcmp.gt.f32.partialorder %v180_v20, %v228_v32  ;;  %vm237_vm10 = vcmp.gt.f32.partialorder %v181_v21, %v229_v36  ;;  %vm238_vm11 = vcmp.gt.f32.partialorder %v182_v24, %v230_v37  ;;  %v243_v41 = vsel %vm235_vm8, 3, %v219_v25  ;;  %v177_v49 = vld [vmem:[%s693_s4 + $0xb0] sm:$0xff]  ;;  %v178_v50 = vld [vmem:[%s693_s4 + $0xb8] sm:$0xff]  ;;  %v183_v59 = vld [vmem:[%s693_s4 + $0xe0] sm:$0xff]  ;;  %p484_p13 = scmp.lt.s32.totalorder %s482_s17, %s476_s15 }
  0x44   : > { %v244_v42 = vsel %vm236_vm9, 3, %v220_v26  ;;  %v245_v43 = vsel %vm237_vm10, 3, %v221_v29  ;;  %v246_v44 = vsel %vm238_vm11, 3, %v222_v30  ;;  %vm191_vm12 = vcmp.gt.f32.partialorder %v167_v35, %v159_v27  ;;  %v184_v60 = vld [vmem:[%s693_s4 + $0xe8] sm:$0xff]  ;;  %v185_v61 = vld [vmem:[%s693_s4 + $0xf0] sm:$0xff]  ;;  %v186_v63 = vld [vmem:[%s693_s4 + $0xf8] sm:$0xff] }
  0x45   : > { %v251_v45 = vpack.c.b16 %v244_v42, %v243_v41  ;;  %v252_v46 = vpack.c.b16 %v246_v44, %v245_v43  ;;  %vm192_vm13 = vcmp.gt.f32.partialorder %v168_v38, %v160_v28  ;;  %vm193_vm14 = vcmp.gt.f32.partialorder %v169_v39, %v161_v33  ;;  %p485_p2 = por %p484_p13, %p483_p6 }
  0x46   : > { %vm194_vm15 = vcmp.gt.f32.partialorder %v170_v40, %v162_v34  ;;  %v199_v51 = vsel %vm191_vm12, 1, %v563_v12  ;;  %v200_v52 = vsel %vm192_vm13, 1, %v563_v12  ;;  %v201_v53 = vsel %vm193_vm14, 1, %v563_v12 }
  0x47   : > { %v202_v54 = vsel %vm194_vm15, 1, %v563_v12  ;;  %v253_v55 = vpack.c.b8 %v252_v46, %v251_v45  ;;  %v207_v56 = vsel %vm191_vm12, %v167_v35, %v159_v27  ;;  %v208_v57 = vsel %vm192_vm13, %v168_v38, %v160_v28  ;;  %p486_p5 = pnand %p485_p2, %p479_p0 }
  0x48   : > { %v209_v58 = vsel %vm193_vm14, %v169_v39, %v161_v33  ;;  %v210_v62 = vsel %vm194_vm15, %v170_v40, %v162_v34  ;;  %vm215_vm0 = vcmp.gt.f32.partialorder %v175_v47, %v207_v56  ;;  %vm216_vm1 = vcmp.gt.f32.partialorder %v176_v48, %v208_v57 }
  0x49   : > { %vm217_vm2 = vcmp.gt.f32.partialorder %v177_v49, %v209_v58  ;;  %257 = vst [vmem:[%s152_s27] sm:$0xff] %v253_v55  ;;  %vm218_vm3 = vcmp.gt.f32.partialorder %v178_v50, %v210_v62  ;;  %v223_v0 = vsel %vm215_vm0, 2, %v199_v51  ;;  %v224_v1 = vsel %vm216_vm1, 2, %v200_v52 }
  0x4a   : > { %v225_v2 = vsel %vm217_vm2, 2, %v201_v53  ;;  %v226_v3 = vsel %vm218_vm3, 2, %v202_v54  ;;  %v231_v4 = vsel %vm215_vm0, %v175_v47, %v207_v56  ;;  %v232_v5 = vsel %vm216_vm1, %v176_v48, %v208_v57 }
  0x4b   : > { %v233_v6 = vsel %vm217_vm2, %v177_v49, %v209_v58  ;;  %v234_v7 = vsel %vm218_vm3, %v178_v50, %v210_v62  ;;  %vm239_vm4 = vcmp.gt.f32.partialorder %v183_v59, %v231_v4  ;;  %vm240_vm5 = vcmp.gt.f32.partialorder %v184_v60, %v232_v5 }
  0x4c   : > { %vm241_vm6 = vcmp.gt.f32.partialorder %v185_v61, %v233_v6  ;;  %vm242_vm7 = vcmp.gt.f32.partialorder %v186_v63, %v234_v7  ;;  %v247_v8 = vsel %vm239_vm4, 3, %v223_v0  ;;  %v248_v9 = vsel %vm240_vm5, 3, %v224_v1 }
  0x4d   : > { %v249_v10 = vsel %vm241_vm6, 3, %v225_v2  ;;  %v250_v11 = vsel %vm242_vm7, 3, %v226_v3  ;;  %v254_v12 = vpack.c.b16 %v248_v9, %v247_v8 }
  0x4e   : > { %v255_v13 = vpack.c.b16 %v250_v11, %v249_v10 }
  0x50   : > { %v256_v14 = vpack.c.b8 %v255_v13, %v254_v12 }
  0x52   : > { %258 = vst [vmem:[%s152_s27 + $0x8] sm:$0xff] %v256_v14 }
  0x53   : > { %489 = shalt.err (!%p486_p5)
}
  0x54   : > { %s490_s22 = scalar_lea.hbm %s740_s12, 256  ;;  %s494_s25 = scalar_lea.hbm %s790_s1, 512 }
  0x55   : > { %p491_p4 = scmp.ne.s32.totalorder %s740_s12, %s490_s22  ;;  %p495_p12 = scmp.lt.u32.totalorder %s740_s12, %s790_s1 }
  0x56   : > { %p496_p1 = scmp.lt.u32.totalorder %s494_s25, %s490_s22  ;;  %p498_p8 = scmp.lt.u32.totalorder %s490_s22, %s740_s12 }
  0x57   : > { %p492_p7 = pnand %p491_p4, %p798_p9 }
  0x58   : > { %p497_p3 = por %p496_p1, %p495_p12 }
  0x59   : > { %p493_p10 = pneg %p492_p7 }
  0x5a   : > { %p499_p11 = por %p498_p8, %p497_p3 }
  0x5c   : > { %p500_p0 = pnand %p499_p11, %p493_p10 }
  0x5e   : > { %503 = shalt.err (!%p500_p0)
}
  0x5f   : > { %s565_s4 = smov 128   ;;  %s566_s18 = smov 8  }
  0x60   : > { %381 = dma.vmem_to_hbm [thread:$0]  (%p798_p9), %s735_s29, 256, %s740_s12, %s260_s13, %s565_s4, %s565_s4, %s566_s18  }
  0x61 PF: > { %s290_s27 = sand.u32 1, %s538_s6   ;;  %p799_p6 = scmp.ne.s32.totalorder %s795_s21, 0 }
  0x62   : > { %p800_p13 = scmp.ge.s32.totalorder %s558_s11, 2  ;;  %s291_s30 = scalar_lea.sflag [#allocation4], %s290_s27 }
  0x64   : > { %p388_p2 = pnand %p800_p13, %p799_p6 }
  0x66   : > { %533 = dma.done.wait (!%p388_p2), %s291_s30, 256  }
  0x67   : > { %535 = vsyncadd (!%p388_p2), %s291_s30, 4294967040  ;;  %s17_s11 = sadd.s32 1, %s558_s11   ;;  %s801_s6 = smov %s542_s7 }
  0x68   : > { %p14_p5 = scmp.ge.s32.totalorder %s17_s11, 4   ;;  %s802_s7 = smov %s546_s8 }
  0x69   : > { %s803_s8 = smov %s633_s20  ;;  %s804_s9 = smov %s554_s10 }
  0x6a   : > { %s805_s10 = smov %s807_s14  ;;  %16 = sbr.rel (!%p14_p5) target bundleno = 6 (0x6), region = 69 }
  0x71   :  { %296 = vsyncpa [#allocation3], 1 }
  0x72   :  { %298 = vsyncpa [#allocation3 + $0x1], 1 }
  0x73   :  { %299 = vsyncpa [#allocation4], 1 }
  0x74   :  { %301 = vsyncpa [#allocation4 + $0x1], 1 }

</bundles_post_ra>
